<compile_context>
chip_gen: v5e
topology: v5e:2x2
jax: 0.10.0
libtpu: 0.0.40
codegen_flags: <defaults>
</compile_context>

<pallas_src>
import jax
import jax.numpy as jnp
from jax.experimental import pallas as pl
from jax.experimental.pallas import tpu as pltpu


def _round_up(x, m):
    return ((x + m - 1) // m) * m


def _reconstructor_kernel(x_ref, w_ref, b_ref, o_ref):
    # x_ref: (tm, d_model)   w_ref: (d_model, n_pad)   b_ref: (1, n_pad)
    # o_ref: (tm, n_bin)     with n_bin <= n_pad (padding sliced before store)
    logits = (
        jnp.dot(x_ref[...], w_ref[...], preferred_element_type=jnp.float32)
        + b_ref[...]                                   # bias is already f32
    )
    # numerically-stable log-softmax along the last (lane) axis; padded
    # columns carry ~-1e30 logits -> exp underflows to 0 in the sum.
    m = jnp.max(logits, axis=-1, keepdims=True)
    shifted = logits - m
    lse = jnp.log(jnp.sum(jnp.exp(shifted), axis=-1, keepdims=True))
    n_out = o_ref.shape[-1]
    o_ref[...] = (shifted - lse)[:, :n_out].astype(o_ref.dtype)


def data_reconstructor(x, weight, bias, *, tm=1024, out_dtype=None,
                       single_buffer_weights=True):
    """x: (batch, seq, d_model); weight: (n_bin, d_model); bias: (n_bin,)."""
    batch, seq, d_model = x.shape
    n_bin = weight.shape[0]
    rows = batch * seq

    in_dtype = x.dtype                       # do NOT recast activations here
    out_dtype = x.dtype if out_dtype is None else out_dtype
    it_in = jnp.dtype(in_dtype).itemsize
    it_out = jnp.dtype(out_dtype).itemsize

    # lane-dense compute width (weights/bias only; output stays n_bin wide)
    n_pad = _round_up(n_bin, 128)

    # ---- row tile ----------------------------------------------------------
    sub = 16 if it_in == 2 else 8            # sublane packing of the input dtype
    row_mult = 256                           # MXU-M friendly on v5e/v6e/v7x
    tm_req = max(_round_up(tm, row_mult), row_mult)
    # keep >= 2 grid steps when rows allow it (v7x: 2 TCs share the parallel axis)
    half_rows = _round_up(pl.cdiv(rows, 2), row_mult)
    tm_eff = min(tm_req, half_rows, _round_up(rows, sub))

    # ---- generation-aware VMEM budget ---------------------------------------
    try:
        vmem_cap = int(pltpu.get_tpu_info().vmem_capacity_bytes)
    except Exception:
        vmem_cap = 64 << 20                  # conservative fallback (v7x size)
    budget = int(vmem_cap * 0.70)            # ~48 MiB on v7x, ~90 MiB on v5e/v6e

    def vmem_need(t):
        return (2 * t * d_model * it_in                        # x tile, double-buffered
                + 2 * t * n_bin * it_out                       # out tile, double-buffered
                + 2 * (d_model * n_pad * it_in + n_pad * 4)    # W^T + bias (worst case 2x)
                + 3 * t * n_pad * 4)                           # live f32 logits/exp temps

    while vmem_need(tm_eff) > budget and tm_eff > sub:
        tm_eff = max(sub, _round_up(tm_eff // 2, sub))
    if tm_eff >= rows:                       # single full block: no overhang needed
        tm_eff = rows

    grid = pl.cdiv(rows, tm_eff)             # partial last block handled by Pallas
    vmem_limit = min(budget, max(int(vmem_need(tm_eff) * 1.5), 16 << 20))

    # ---- operands: no row padding, no activation recast ---------------------
    x2d = x.reshape(rows, d_model)           # reshape is metadata-only
    w_t = weight.T.astype(in_dtype)          # parameter-sized; (d_model, n_bin)
    b2d = bias.reshape(1, n_bin).astype(jnp.float32)
    if n_pad != n_bin:
        w_t = jnp.pad(w_t, ((0, 0), (0, n_pad - n_bin)))
        # large-negative (not -inf) padding: exp() -> 0 in the LSE; these
        # columns are sliced off inside the kernel before the store.
        b2d = jnp.pad(b2d, ((0, 0), (0, n_pad - n_bin)), constant_values=-1e30)

    cost = pl.CostEstimate(
        flops=2 * rows * d_model * n_pad,
        transcendentals=rows * n_pad + rows,               # exp + log
        bytes_accessed=(rows * d_model * it_in
                        + d_model * n_pad * it_in + n_pad * 4
                        + rows * n_bin * it_out),
    )

    def build(single_buffer):
        wb_kw = dict(pipeline_mode=pl.Buffered(1)) if single_buffer else {}
        return pl.pallas_call(
            _reconstructor_kernel,
            out_shape=jax.ShapeDtypeStruct((rows, n_bin), out_dtype),
            grid_spec=pltpu.PrefetchScalarGridSpec(
                num_scalar_prefetch=0,
                grid=(grid,),
                in_specs=[
                    pl.BlockSpec((tm_eff, d_model), lambda i: (i, 0)),   # x rows
                    pl.BlockSpec((d_model, n_pad), lambda i: (0, 0), **wb_kw),
                    pl.BlockSpec((1, n_pad), lambda i: (0, 0), **wb_kw),
                ],
                out_specs=pl.BlockSpec((tm_eff, n_bin), lambda i: (i, 0)),
            ),
            compiler_params=pltpu.CompilerParams(
                dimension_semantics=("parallel",),
                vmem_limit_bytes=vmem_limit,
            ),
            cost_estimate=cost,
        )

    # Single-buffering of the grid-invariant weight/bias blocks is a VMEM
    # optimization only; fall back transparently if this Pallas build rejects
    # Buffered(1). (Fallback only triggers under eager dispatch.)
    if single_buffer_weights:
        try:
            out2d = build(True)(x2d, w_t, b2d)
        except Exception:
            out2d = build(False)(x2d, w_t, b2d)
    else:
        out2d = build(False)(x2d, w_t, b2d)

    return out2d.reshape(batch, seq, n_bin)


if __name__ == "__main__":
    key = jax.random.PRNGKey(0)
    kx1, kx2, kw, kb = jax.random.split(key, 4)

    d_model, n_bin = 32, 100
    weight = jax.random.normal(kw, (n_bin, d_model), dtype=jnp.float32) * 0.05
    bias = jax.random.normal(kb, (n_bin,), dtype=jnp.float32) * 0.05

    def ref(a):
        return jax.nn.log_softmax(a @ weight.T + bias, axis=-1)

    # Case 1: small shapes consistent with the module's forward.
    x1 = jax.random.normal(kx1, (2, 8, d_model), dtype=jnp.float32)
    out1 = jax.block_until_ready(data_reconstructor(x1, weight, bias))
    assert out1.shape == (2, 8, n_bin)
    assert jnp.allclose(out1, ref(x1), atol=1e-5, rtol=1e-5)

    # Case 2: rows not a multiple of 8 -> exercises the padded-tail-row path
    # (no wrapper-side row padding; tail rows are never written back).
    x2 = jax.random.normal(kx2, (2, 13, d_model), dtype=jnp.float32)
    out2 = jax.block_until_ready(data_reconstructor(x2, weight, bias))
    assert out2.shape == (2, 13, n_bin)
    assert jnp.allclose(out2, ref(x2), atol=1e-5, rtol=1e-5)

    print("KERNEL_OK")
</pallas_src>

<mosaic_0001>
module attributes {stable_mosaic.version = 11 : i64} {
  func.func @_reconstructor_kernel(%arg0: i32, %arg1: memref<16x32xf32, #tpu.memory_space<vmem>>, %arg2: memref<32x128xf32, #tpu.memory_space<vmem>>, %arg3: memref<1x128xf32, #tpu.memory_space<vmem>>, %arg4: memref<16x100xf32, #tpu.memory_space<vmem>>) attributes {dimension_semantics = [#tpu.dimension_semantics<parallel>], iteration_bounds = array<i64: 1>, scalar_prefetch = 0 : i64, scratch_operands = 0 : i64, tpu.core_type = #tpu.core_type<tc>, window_params = [{transform_indices = @transform_0, window_bounds = array<i64: 16, 32>}, {pipeline_mode = #tpu.pipeline_mode<synchronous>, transform_indices = @transform_1, window_bounds = array<i64: 32, 128>}, {pipeline_mode = #tpu.pipeline_mode<synchronous>, transform_indices = @transform_2, window_bounds = array<i64: 1, 128>}, {transform_indices = @transform_3, window_bounds = array<i64: 16, 100>}]} {
    %c0 = arith.constant 0 : index
    %c0_0 = arith.constant 0 : index
    %0 = vector.load %arg1[%c0, %c0_0] : memref<16x32xf32, #tpu.memory_space<vmem>>, vector<16x32xf32>
    %c0_1 = arith.constant 0 : index
    %c0_2 = arith.constant 0 : index
    %1 = vector.load %arg2[%c0_1, %c0_2] : memref<32x128xf32, #tpu.memory_space<vmem>>, vector<32x128xf32>
    %cst = arith.constant dense<0.000000e+00> : vector<16x128xf32>
    %2 = tpu.matmul %0, %1, %cst {dimension_numbers = #tpu.dot_dimension_numbers<[1], [0], [0], [1], [0, 0, 1, 1], [], []>} : vector<16x32xf32>, vector<32x128xf32>, vector<16x128xf32> -> vector<16x128xf32>
    %c0_3 = arith.constant 0 : index
    %c0_4 = arith.constant 0 : index
    %3 = vector.load %arg3[%c0_3, %c0_4] : memref<1x128xf32, #tpu.memory_space<vmem>>, vector<1x128xf32>
    %4 = vector.broadcast %3 : vector<1x128xf32> to vector<16x128xf32>
    %5 = arith.addf %2, %4 : vector<16x128xf32>
    %cst_5 = arith.constant dense<0xFF800000> : vector<16xf32>
    %6 = vector.multi_reduction <maximumf>, %5, %cst_5 [1] : vector<16x128xf32> to vector<16xf32>
    %7 = vector.shape_cast %6 : vector<16xf32> to vector<16x1xf32>
    %8 = vector.broadcast %7 : vector<16x1xf32> to vector<16x128xf32>
    %9 = arith.subf %5, %8 : vector<16x128xf32>
    %10 = math.exp %9 : vector<16x128xf32>
    %cst_6 = arith.constant dense<0.000000e+00> : vector<16xf32>
    %11 = vector.multi_reduction <add>, %10, %cst_6 [1] : vector<16x128xf32> to vector<16xf32>
    %12 = vector.shape_cast %11 : vector<16xf32> to vector<16x1xf32>
    %13 = math.log %12 : vector<16x1xf32>
    %14 = vector.broadcast %13 : vector<16x1xf32> to vector<16x128xf32>
    %15 = arith.subf %9, %14 : vector<16x128xf32>
    %16 = vector.extract_strided_slice %15 {offsets = [0, 0], sizes = [16, 100], strides = [1, 1]} : vector<16x128xf32> to vector<16x100xf32>
    %c0_7 = arith.constant 0 : index
    %c0_8 = arith.constant 0 : index
    %17 = vector.load %arg4[%c0_7, %c0_8] : memref<16x100xf32, #tpu.memory_space<vmem>>, vector<16x100xf32>
    tpu.vector_store %arg4[%c0_7, %c0_8], %16 {strides = array<i32>} : memref<16x100xf32, #tpu.memory_space<vmem>>, vector<16x100xf32>,
    return
  }
  func.func @transform_0(%arg0: i32) -> (i32, i32) {
    %c0_i32 = arith.constant 0 : i32
    %c0_i32_0 = arith.constant 0 : i32
    return %arg0, %c0_i32 : i32, i32
  }
  func.func @transform_1(%arg0: i32) -> (i32, i32) {
    %c0_i32 = arith.constant 0 : i32
    %c0_i32_0 = arith.constant 0 : i32
    %c0_i32_1 = arith.constant 0 : i32
    return %c0_i32, %c0_i32_0 : i32, i32
  }
  func.func @transform_2(%arg0: i32) -> (i32, i32) {
    %c0_i32 = arith.constant 0 : i32
    %c0_i32_0 = arith.constant 0 : i32
    %c0_i32_1 = arith.constant 0 : i32
    return %c0_i32, %c0_i32_0 : i32, i32
  }
  func.func @transform_3(%arg0: i32) -> (i32, i32) {
    %c0_i32 = arith.constant 0 : i32
    %c0_i32_0 = arith.constant 0 : i32
    return %arg0, %c0_i32 : i32, i32
  }
}

module attributes {stable_mosaic.version = 11 : i64} {
  func.func @_reconstructor_kernel(%arg0: i32, %arg1: memref<16x32xf32, #tpu.memory_space<vmem>>, %arg2: memref<32x128xf32, #tpu.memory_space<vmem>>, %arg3: memref<1x128xf32, #tpu.memory_space<vmem>>, %arg4: memref<16x100xf32, #tpu.memory_space<vmem>>) attributes {dimension_semantics = [#tpu.dimension_semantics<parallel>], iteration_bounds = array<i64: 1>, scalar_prefetch = 0 : i64, scratch_operands = 0 : i64, tpu.core_type = #tpu.core_type<tc>, window_params = [{transform_indices = @transform_0, window_bounds = array<i64: 16, 32>}, {pipeline_mode = #tpu.pipeline_mode<synchronous>, transform_indices = @transform_1, window_bounds = array<i64: 32, 128>}, {pipeline_mode = #tpu.pipeline_mode<synchronous>, transform_indices = @transform_2, window_bounds = array<i64: 1, 128>}, {transform_indices = @transform_3, window_bounds = array<i64: 16, 100>}]} {
    %c0 = arith.constant 0 : index
    %c0_0 = arith.constant 0 : index
    %0 = vector.load %arg1[%c0, %c0_0] : memref<16x32xf32, #tpu.memory_space<vmem>>, vector<16x32xf32>
    %c0_1 = arith.constant 0 : index
    %c0_2 = arith.constant 0 : index
    %1 = vector.load %arg2[%c0_1, %c0_2] : memref<32x128xf32, #tpu.memory_space<vmem>>, vector<32x128xf32>
    %cst = arith.constant dense<0.000000e+00> : vector<16x128xf32>
    %2 = tpu.matmul %0, %1, %cst {dimension_numbers = #tpu.dot_dimension_numbers<[1], [0], [0], [1], [0, 0, 1, 1], [], []>} : vector<16x32xf32>, vector<32x128xf32>, vector<16x128xf32> -> vector<16x128xf32>
    %c0_3 = arith.constant 0 : index
    %c0_4 = arith.constant 0 : index
    %3 = vector.load %arg3[%c0_3, %c0_4] : memref<1x128xf32, #tpu.memory_space<vmem>>, vector<1x128xf32>
    %4 = vector.broadcast %3 : vector<1x128xf32> to vector<16x128xf32>
    %5 = arith.addf %2, %4 : vector<16x128xf32>
    %cst_5 = arith.constant dense<0xFF800000> : vector<16xf32>
    %6 = vector.multi_reduction <maximumf>, %5, %cst_5 [1] : vector<16x128xf32> to vector<16xf32>
    %7 = vector.shape_cast %6 : vector<16xf32> to vector<16x1xf32>
    %8 = vector.broadcast %7 : vector<16x1xf32> to vector<16x128xf32>
    %9 = arith.subf %5, %8 : vector<16x128xf32>
    %10 = math.exp %9 : vector<16x128xf32>
    %cst_6 = arith.constant dense<0.000000e+00> : vector<16xf32>
    %11 = vector.multi_reduction <add>, %10, %cst_6 [1] : vector<16x128xf32> to vector<16xf32>
    %12 = vector.shape_cast %11 : vector<16xf32> to vector<16x1xf32>
    %13 = math.log %12 : vector<16x1xf32>
    %14 = vector.broadcast %13 : vector<16x1xf32> to vector<16x128xf32>
    %15 = arith.subf %9, %14 : vector<16x128xf32>
    %16 = vector.extract_strided_slice %15 {offsets = [0, 0], sizes = [16, 100], strides = [1, 1]} : vector<16x128xf32> to vector<16x100xf32>
    %c0_7 = arith.constant 0 : index
    %c0_8 = arith.constant 0 : index
    %17 = vector.load %arg4[%c0_7, %c0_8] : memref<16x100xf32, #tpu.memory_space<vmem>>, vector<16x100xf32>
    tpu.vector_store %arg4[%c0_7, %c0_8], %16 {strides = array<i32>} : memref<16x100xf32, #tpu.memory_space<vmem>>, vector<16x100xf32>,
    return
  }
  func.func @transform_0(%arg0: i32) -> (i32, i32) {
    %c0_i32 = arith.constant 0 : i32
    %c0_i32_0 = arith.constant 0 : i32
    return %arg0, %c0_i32 : i32, i32
  }
  func.func @transform_1(%arg0: i32) -> (i32, i32) {
    %c0_i32 = arith.constant 0 : i32
    %c0_i32_0 = arith.constant 0 : i32
    %c0_i32_1 = arith.constant 0 : i32
    return %c0_i32, %c0_i32_0 : i32, i32
  }
  func.func @transform_2(%arg0: i32) -> (i32, i32) {
    %c0_i32 = arith.constant 0 : i32
    %c0_i32_0 = arith.constant 0 : i32
    %c0_i32_1 = arith.constant 0 : i32
    return %c0_i32, %c0_i32_0 : i32, i32
  }
  func.func @transform_3(%arg0: i32) -> (i32, i32) {
    %c0_i32 = arith.constant 0 : i32
    %c0_i32_0 = arith.constant 0 : i32
    return %arg0, %c0_i32 : i32, i32
  }
}

</mosaic_0001>

<bundles_post_ra>
// kernel: tpu_custom_call.1
= control target key start
LH: loop header
LB: loop body
LE: loop exit
PB: predicated region body
PF: predicated region fallthrough
CT: control target
= control target key end

     0   :  { %8 = vsyncpa [#allocation3], 0  ;;  %s274_s0 = inlined_call_operand.hbm [shape: f32[16,32], index: 0, kind: input, shape index: {}]   ;;  %s275_s1 = inlined_call_operand.hbm [shape: f32[32,128], index: 1, kind: input, shape index: {}]   ;;  %s276_s2 = inlined_call_operand.vmem [shape: f32[1,128], index: 2, kind: input, shape index: {}]   ;;  %s277_s3 = inlined_call_operand.hbm [shape: f32[16,100], index: 3, kind: output, shape index: {}]  }
   0x1   :  { %9 = vsyncpa [#allocation6], 0 }
   0x2   :  { %10 = vsyncpa [#allocation4], 0  ;;  %s15_s14 = sshll.u32 %s274_s0, 4  ;;  %s228_s15 = smov [#allocation2]   ;;  %s16_s14 = int_to_ptr.hbm [resolvable:$true] %s15_s14 }
   0x3   :  { %s17_s16 = sshll.u32 %s228_s15, 4  ;;  %s28_s19 = sshll.u32 %s275_s1, 4  ;;  %s18_s16 = int_to_ptr.vmem [resolvable:$true] %s17_s16  ;;  %s29_s19 = int_to_ptr.hbm [resolvable:$true] %s28_s19 }
   0x4   :  { %s229_s20 = smov 128   ;;  %s230_s21 = smov 8  }
   0x5   :  { %23 = dma.hbm_to_vmem [thread:$0]  %s16_s14, 256, %s18_s16, [#allocation3], %s229_s20, %s229_s20, %s230_s21  }
   0x6   :  { %s231_s22 = smov [#allocation5]  }
   0x7   :  { %s30_s23 = sshll.u32 %s231_s22, 4  ;;  %s31_s23 = int_to_ptr.vmem [resolvable:$true] %s30_s23 }
   0x8   :  { %36 = dma.hbm_to_vmem [thread:$0]  %s29_s19, 512, %s31_s23, [#allocation6], %s229_s20, %s229_s20, %s230_s21  }
   0x9   :  { %222 = dma.done.wait [#allocation3], 256  }
   0xa   :  { %223 = vsyncadd [#allocation3], 4294967040 }
   0xb   :  { %224 = dma.done.wait [#allocation6], 512  }
   0xc   :  { %225 = vsyncadd [#allocation6], 4294966784  ;;  %v52_v0 = vld [vmem:[#allocation5 + $0x18] sm:$0xff]  ;;  %v51_v1 = vld [vmem:[#allocation5 + $0x10] sm:$0xff]  ;;  %vm57_vm0 = vcmask 261120   ;;  %vm107_vm1 = vcmask 818176  }
   0xd   :  { %76 = vmatpush.msra.mxu0 %v52_v0  ;;  %132 = vmatpush.msra.mxu1 %v52_v0  ;;  %v50_v2 = vld [vmem:[#allocation5 + $0x8] sm:$0xff]  ;;  %v49_v3 = vld [vmem:[#allocation5] sm:$0xff]  ;;  %v47_v4 = vld [vmem:[#allocation2] sm:$0xff]  ;;  %s116_s27 = sshll.u32 %s277_s3, 4  ;;  %s117_s27 = int_to_ptr.hbm [resolvable:$true] %s116_s27 }
   0xe   :  { %v48_v5 = vld [vmem:[#allocation2 + $0x8] sm:$0xff]  ;;  %v141_v6 = vld [vmem:[%s276_s2] ss:$0 sm:$0xff]  ;;  %s232_s2 = smov [#allocation7]  }
   0xf   :  { %77 = vmatpush.msra.mxu0 %v51_v1  ;;  %133 = vmatpush.msra.mxu1 %v51_v1  ;;  %s114_s24 = sshll.u32 %s232_s2, 4  ;;  %s115_s24 = int_to_ptr.vmem [resolvable:$true] %s114_s24 }
  0x11   :  { %78 = vmatpush.msra.mxu0 %v50_v2  ;;  %134 = vmatpush.msra.mxu1 %v50_v2 }
  0x13   :  { %79 = vmatpush.msra.mxu0 %v49_v3  ;;  %135 = vmatpush.msra.mxu1 %v49_v3 }
  0x14   :  { %130 = vmatmul.msk.f32.vlgmr.msra.gmra.mxu0 %vm57_vm0, %v47_v4  ;;  %131 = vmatmul.msk.f32.vlgmr.msra.gmra.mxu1 %vm57_vm0, %v48_v5 }
  0x91   :  { %v81_v7 = vpop.f32.mrf.mxu0  ;;  %v84_v9 = vpop.f32.mrf.mxu1 }
  0x92   :  { %v82_v8 = vadd.f32 %v141_v6, %v81_v7  ;;  %v85_v10 = vadd.f32 %v141_v6, %v84_v9 }
  0x94   :  { %87 = vmax.xlane.f32.xlu0 %v82_v8 }
  0x9c   :  { %89 = vmax.xlane.f32.xlu0 %v85_v10 }
 0x107   :  { %v88_v11 = vpop.xlane.xlu0 %87 }
 0x108   :  { %v91_v12 = vsub.f32 %v82_v8, %v88_v11 }
 0x10a   :  { %v93_v13 = vmul.f32 1.442695, %v91_v12 }
 0x10c   :  { %142 = vpow2.f32 %v93_v13 }
 0x10f   :  { %v90_v14 = vpop.xlane.xlu0 %89 }
 0x110   :  { %v92_v15 = vsub.f32 %v85_v10, %v90_v14 }
 0x112   :  { %v143_v16 = vpop.eup %142  ;;  %v95_v17 = vmul.f32 1.442695, %v92_v15 }
 0x113   :  { %97 = vadd.xlane.f32.xlu1 %v143_v16 }
 0x114   :  { %144 = vpow2.f32 %v95_v17 }
 0x11a   :  { %v145_v18 = vpop.eup %144 }
 0x11b   :  { %99 = vadd.xlane.f32.xlu1 %v145_v18 }
 0x186   :  { %v98_v19 = vpop.xlane.xlu1 %97 }
 0x187   :  { %146 = vlog2.f32 %v98_v19 }
 0x18d   :  { %v147_v20 = vpop.eup %146 }
 0x18e   :  { %v102_v21 = vmul.f32 0.6931472, %v147_v20  ;;  %v100_v22 = vpop.xlane.xlu1 %99 }
 0x18f   :  { %148 = vlog2.f32 %v100_v22 }
 0x190   :  { %v105_v23 = vsub.f32 %v91_v12, %v102_v21 }
 0x192   :  { %108 = vst.msk [vmem:[#allocation7] sm:$0xff] %vm107_vm1, %v105_v23 }
 0x195   :  { %v149_v24 = vpop.eup %148 }
 0x196   :  { %v104_v25 = vmul.f32 0.6931472, %v149_v24 }
 0x198   :  { %v106_v26 = vsub.f32 %v92_v15, %v104_v25 }
 0x19a   :  { %109 = vst.msk [vmem:[#allocation7 + $0x8] sm:$0xff] %vm107_vm1, %v106_v26 }
 0x19b   :  { %122 = dma.vmem_to_hbm [thread:$0]  %s115_s24, 256, %s117_s27, [#allocation4], %s229_s20, %s229_s20, %s230_s21  }
 0x19c   :  { %226 = dma.done.wait [#allocation4], 256  }
 0x19d   :  { %227 = vsyncadd [#allocation4], 4294967040 }
 0x19e   :  { %127 = vsyncpa [#allocation3], 1 }
 0x19f   :  { %128 = vsyncpa [#allocation6], 1 }
 0x1a0   :  { %129 = vsyncpa [#allocation4], 1 }

// kernel: tpu_custom_call.1
= control target key start
LH: loop header
LB: loop body
LE: loop exit
PB: predicated region body
PF: predicated region fallthrough
CT: control target
= control target key end

     0   :  { %8 = vsyncpa [#allocation3], 0  ;;  %s274_s0 = inlined_call_operand.hbm [shape: f32[16,32], index: 0, kind: input, shape index: {}]   ;;  %s275_s1 = inlined_call_operand.hbm [shape: f32[32,128], index: 1, kind: input, shape index: {}]   ;;  %s276_s2 = inlined_call_operand.vmem [shape: f32[1,128], index: 2, kind: input, shape index: {}]   ;;  %s277_s3 = inlined_call_operand.hbm [shape: f32[16,100], index: 3, kind: output, shape index: {}]  }
   0x1   :  { %9 = vsyncpa [#allocation6], 0 }
   0x2   :  { %10 = vsyncpa [#allocation4], 0  ;;  %s15_s14 = sshll.u32 %s274_s0, 4  ;;  %s228_s15 = smov [#allocation2]   ;;  %s16_s14 = int_to_ptr.hbm [resolvable:$true] %s15_s14 }
   0x3   :  { %s17_s16 = sshll.u32 %s228_s15, 4  ;;  %s28_s19 = sshll.u32 %s275_s1, 4  ;;  %s18_s16 = int_to_ptr.vmem [resolvable:$true] %s17_s16  ;;  %s29_s19 = int_to_ptr.hbm [resolvable:$true] %s28_s19 }
   0x4   :  { %s229_s20 = smov 128   ;;  %s230_s21 = smov 8  }
   0x5   :  { %23 = dma.hbm_to_vmem [thread:$0]  %s16_s14, 256, %s18_s16, [#allocation3], %s229_s20, %s229_s20, %s230_s21  }
   0x6   :  { %s231_s22 = smov [#allocation5]  }
   0x7   :  { %s30_s23 = sshll.u32 %s231_s22, 4  ;;  %s31_s23 = int_to_ptr.vmem [resolvable:$true] %s30_s23 }
   0x8   :  { %36 = dma.hbm_to_vmem [thread:$0]  %s29_s19, 512, %s31_s23, [#allocation6], %s229_s20, %s229_s20, %s230_s21  }
   0x9   :  { %222 = dma.done.wait [#allocation3], 256  }
   0xa   :  { %223 = vsyncadd [#allocation3], 4294967040 }
   0xb   :  { %224 = dma.done.wait [#allocation6], 512  }
   0xc   :  { %225 = vsyncadd [#allocation6], 4294966784  ;;  %v52_v0 = vld [vmem:[#allocation5 + $0x18] sm:$0xff]  ;;  %v51_v1 = vld [vmem:[#allocation5 + $0x10] sm:$0xff]  ;;  %vm57_vm0 = vcmask 261120   ;;  %vm107_vm1 = vcmask 818176  }
   0xd   :  { %76 = vmatpush.msra.mxu0 %v52_v0  ;;  %132 = vmatpush.msra.mxu1 %v52_v0  ;;  %v50_v2 = vld [vmem:[#allocation5 + $0x8] sm:$0xff]  ;;  %v49_v3 = vld [vmem:[#allocation5] sm:$0xff]  ;;  %v47_v4 = vld [vmem:[#allocation2] sm:$0xff]  ;;  %s116_s27 = sshll.u32 %s277_s3, 4  ;;  %s117_s27 = int_to_ptr.hbm [resolvable:$true] %s116_s27 }
   0xe   :  { %v48_v5 = vld [vmem:[#allocation2 + $0x8] sm:$0xff]  ;;  %v141_v6 = vld [vmem:[%s276_s2] ss:$0 sm:$0xff]  ;;  %s232_s2 = smov [#allocation7]  }
   0xf   :  { %77 = vmatpush.msra.mxu0 %v51_v1  ;;  %133 = vmatpush.msra.mxu1 %v51_v1  ;;  %s114_s24 = sshll.u32 %s232_s2, 4  ;;  %s115_s24 = int_to_ptr.vmem [resolvable:$true] %s114_s24 }
  0x11   :  { %78 = vmatpush.msra.mxu0 %v50_v2  ;;  %134 = vmatpush.msra.mxu1 %v50_v2 }
  0x13   :  { %79 = vmatpush.msra.mxu0 %v49_v3  ;;  %135 = vmatpush.msra.mxu1 %v49_v3 }
  0x14   :  { %130 = vmatmul.msk.f32.vlgmr.msra.gmra.mxu0 %vm57_vm0, %v47_v4  ;;  %131 = vmatmul.msk.f32.vlgmr.msra.gmra.mxu1 %vm57_vm0, %v48_v5 }
  0x91   :  { %v81_v7 = vpop.f32.mrf.mxu0  ;;  %v84_v9 = vpop.f32.mrf.mxu1 }
  0x92   :  { %v82_v8 = vadd.f32 %v141_v6, %v81_v7  ;;  %v85_v10 = vadd.f32 %v141_v6, %v84_v9 }
  0x94   :  { %87 = vmax.xlane.f32.xlu0 %v82_v8 }
  0x9c   :  { %89 = vmax.xlane.f32.xlu0 %v85_v10 }
 0x107   :  { %v88_v11 = vpop.xlane.xlu0 %87 }
 0x108   :  { %v91_v12 = vsub.f32 %v82_v8, %v88_v11 }
 0x10a   :  { %v93_v13 = vmul.f32 1.442695, %v91_v12 }
 0x10c   :  { %142 = vpow2.f32 %v93_v13 }
 0x10f   :  { %v90_v14 = vpop.xlane.xlu0 %89 }
 0x110   :  { %v92_v15 = vsub.f32 %v85_v10, %v90_v14 }
 0x112   :  { %v143_v16 = vpop.eup %142  ;;  %v95_v17 = vmul.f32 1.442695, %v92_v15 }
 0x113   :  { %97 = vadd.xlane.f32.xlu1 %v143_v16 }
 0x114   :  { %144 = vpow2.f32 %v95_v17 }
 0x11a   :  { %v145_v18 = vpop.eup %144 }
 0x11b   :  { %99 = vadd.xlane.f32.xlu1 %v145_v18 }
 0x186   :  { %v98_v19 = vpop.xlane.xlu1 %97 }
 0x187   :  { %146 = vlog2.f32 %v98_v19 }
 0x18d   :  { %v147_v20 = vpop.eup %146 }
 0x18e   :  { %v102_v21 = vmul.f32 0.6931472, %v147_v20  ;;  %v100_v22 = vpop.xlane.xlu1 %99 }
 0x18f   :  { %148 = vlog2.f32 %v100_v22 }
 0x190   :  { %v105_v23 = vsub.f32 %v91_v12, %v102_v21 }
 0x192   :  { %108 = vst.msk [vmem:[#allocation7] sm:$0xff] %vm107_vm1, %v105_v23 }
 0x195   :  { %v149_v24 = vpop.eup %148 }
 0x196   :  { %v104_v25 = vmul.f32 0.6931472, %v149_v24 }
 0x198   :  { %v106_v26 = vsub.f32 %v92_v15, %v104_v25 }
 0x19a   :  { %109 = vst.msk [vmem:[#allocation7 + $0x8] sm:$0xff] %vm107_vm1, %v106_v26 }
 0x19b   :  { %122 = dma.vmem_to_hbm [thread:$0]  %s115_s24, 256, %s117_s27, [#allocation4], %s229_s20, %s229_s20, %s230_s21  }
 0x19c   :  { %226 = dma.done.wait [#allocation4], 256  }
 0x19d   :  { %227 = vsyncadd [#allocation4], 4294967040 }
 0x19e   :  { %127 = vsyncpa [#allocation3], 1 }
 0x19f   :  { %128 = vsyncpa [#allocation6], 1 }
 0x1a0   :  { %129 = vsyncpa [#allocation4], 1 }

</bundles_post_ra>
